<compile_context>
chip_gen: v7x
topology: tpu7x:2x2x1
jax: 0.10.0
libtpu: 0.0.40
codegen_flags: <defaults>
</compile_context>

<pallas_src>
import functools

import jax
import jax.numpy as jnp
from jax.experimental import pallas as pl
from jax.experimental.pallas import tpu as pltpu


def _round_up(x, m):
    return ((x + m - 1) // m) * m


def classifier_head_kernel(feat_ref, wd_ref, bd_ref, wo_ref, bo_ref, lab_ref,
                           prob_ref, loss_ref):
    """dense -> tanh -> out_proj -> softmax + per-row CE contributions.

    One grid step handles a (TB, H) batch tile. Weights arrive in bf16 with
    grid-invariant BlockSpecs (VMEM-resident across tiles); both matmuls
    accumulate in f32 on the MXU. The label axis is pre-padded to a lane-dense
    width with -1e30 bias so padding lanes vanish under softmax / CE.
    nn.Dropout is identity (eval mode, matching Model.get_results).
    """
    x = feat_ref[...]                                   # (TB, H) bf16
    h = jnp.tanh(
        jnp.dot(x, wd_ref[...], preferred_element_type=jnp.float32) + bd_ref[...]
    ).astype(jnp.bfloat16)                              # dense + tanh
    logits = (
        jnp.dot(h, wo_ref[...], preferred_element_type=jnp.float32) + bo_ref[...]
    )                                                   # (TB, LP) f32; pad lanes ~ -1e30

    # F.softmax(logits, dim=1); padding lanes underflow to exp(.) == 0.
    m = jnp.max(logits, axis=-1, keepdims=True)
    e = jnp.exp(logits - m)
    s = jnp.sum(e, axis=-1, keepdims=True)
    prob_ref[...] = e / s                               # exact normalization (VALU slack)

    # CrossEntropyLoss per-row term: logsumexp(logits) - logits[label]
    lse = m + jnp.log(s)                                # (TB, 1)
    lab = lab_ref[...]                                  # (TB, 1) int32, -1 => ignore
    col = jax.lax.broadcasted_iota(jnp.int32, logits.shape, 1)
    tgt = jnp.sum(jnp.where(col == lab, logits, 0.0),
                  axis=-1, keepdims=True)               # (TB, 1) gather
    valid = (lab >= 0).astype(jnp.float32)              # mask pad / ignored rows
    loss_ref[...] = (lse - tgt) * valid                 # (TB, 1)


def prepare_params(params):
    """Run ONCE: cast/pad weights into the kernel layout (bf16, lane-dense labels)."""
    L = params["w_out"].shape[1]
    LP = _round_up(L, 128)
    kparams = {
        # TODO(synk): the pretrained RoBERTa encoder is an external module passed
        # to Model.__init__; it is stood in by a deterministic embedding lookup of
        # only the CLS token (the head consumes features[:, 0, :] exclusively).
        "embed":   params["embed"],
        "w_dense": params["w_dense"].astype(jnp.bfloat16),
        "b_dense": params["b_dense"].astype(jnp.float32),
        "w_out":   jnp.pad(params["w_out"], ((0, 0), (0, LP - L))).astype(jnp.bfloat16),
        # pad bias with a large negative so padded logits vanish under softmax / CE;
        # must stay f32 (bf16 cast of -1e30 would overflow to -inf).
        "b_out":   jnp.pad(params["b_out"], ((0, 0), (0, LP - L)),
                           constant_values=-1e30).astype(jnp.float32),
    }
    return kparams, L


@functools.partial(jax.jit, static_argnames=("block_size", "num_labels"))
def model_forward(input_ids, labels, kparams, block_size, num_labels):
    """Mirror of Model.forward(input_ids, labels) -> (loss, prob)."""
    input_ids = input_ids.reshape(-1, block_size)            # .view(-1, block_size)

    # CLS-only gather + mask + bf16 cast, fused with the pallas_call by XLA.
    cls_ids = input_ids[:, 0]
    cls_mask = (cls_ids != 1)[:, None]                        # input_ids.ne(1) on CLS
    cls_feat = jnp.where(cls_mask, kparams["embed"][cls_ids], 0.0).astype(jnp.bfloat16)

    B, H = cls_feat.shape
    L = num_labels
    LP = kparams["w_out"].shape[1]

    # Pad batch to a sublane-friendly multiple of 16 and tile it over the grid.
    BP = _round_up(max(B, 16), 16)
    TB = min(128, BP)
    BP = _round_up(BP, TB)
    n_tiles = BP // TB

    feat = jnp.pad(cls_feat, ((0, BP - B), (0, 0)))
    labels_p = jnp.pad(labels.astype(jnp.int32), (0, BP - B),
                       constant_values=-1).reshape(BP, 1)     # -1 marks pad rows

    cost = pl.CostEstimate(
        flops=2 * BP * H * (H + LP),
        transcendentals=BP * (H + LP),
        bytes_accessed=(
            2 * (feat.size + kparams["w_dense"].size + kparams["w_out"].size)  # bf16
            + 4 * (kparams["b_dense"].size + kparams["b_out"].size + labels_p.size)
            + 4 * (BP * LP + BP)                                                # outputs
        ),
    )

    prob_padded, loss_rows = pl.pallas_call(
        classifier_head_kernel,
        out_shape=(
            jax.ShapeDtypeStruct((BP, LP), jnp.float32),      # prob (lane-dense)
            jax.ShapeDtypeStruct((BP, 1), jnp.float32),       # per-row CE terms
        ),
        grid=(n_tiles,),
        in_specs=[
            pl.BlockSpec((TB, H), lambda i: (i, 0)),          # CLS features (bf16)
            pl.BlockSpec((H, H), lambda i: (0, 0)),           # dense.weight^T (bf16, resident)
            pl.BlockSpec((1, H), lambda i: (0, 0)),           # dense.bias (f32, resident)
            pl.BlockSpec((H, LP), lambda i: (0, 0)),          # out_proj.weight^T (bf16, resident)
            pl.BlockSpec((1, LP), lambda i: (0, 0)),          # out_proj.bias (f32, resident)
            pl.BlockSpec((TB, 1), lambda i: (i, 0)),          # labels (int32)
        ],
        out_specs=(
            pl.BlockSpec((TB, LP), lambda i: (i, 0)),
            pl.BlockSpec((TB, 1), lambda i: (i, 0)),
        ),
        compiler_params=pltpu.CompilerParams(
            dimension_semantics=("parallel",)),               # v7x: 2 TCs split the tiles
        cost_estimate=cost,
    )(feat, kparams["w_dense"], kparams["b_dense"],
      kparams["w_out"], kparams["b_out"], labels_p)

    # CrossEntropyLoss(mean) over valid (non-pad, non-ignored) rows.
    # TODO(synk): PyTorch's ignore_index is specifically -100; here any negative
    # label is treated as ignored.
    denom = jnp.maximum(jnp.sum((labels >= 0).astype(jnp.float32)), 1.0)
    loss = jnp.sum(loss_rows) / denom
    return loss, prob_padded[:B, :L]


def init_params(key, vocab_size, hidden_size, num_labels):
    """Deterministic parameter init (shapes from RobertaClassificationHead)."""
    k_emb, k_wd, k_bd, k_wo, k_bo = jax.random.split(key, 5)
    scale = 0.02
    return {
        "embed":   scale * jax.random.normal(k_emb, (vocab_size, hidden_size), jnp.float32),
        "w_dense": scale * jax.random.normal(k_wd, (hidden_size, hidden_size), jnp.float32),
        "b_dense": scale * jax.random.normal(k_bd, (1, hidden_size), jnp.float32),
        "w_out":   scale * jax.random.normal(k_wo, (hidden_size, num_labels), jnp.float32),
        "b_out":   scale * jax.random.normal(k_bo, (1, num_labels), jnp.float32),
    }


def reference_forward(input_ids, labels, params, block_size):
    """Pure-JAX f32 reference of the same forward (for correctness check)."""
    ids = input_ids.reshape(-1, block_size)
    cls_ids = ids[:, 0]
    x = params["embed"][cls_ids] * (cls_ids != 1).astype(jnp.float32)[:, None]
    h = jnp.tanh(x @ params["w_dense"] + params["b_dense"])
    logits = h @ params["w_out"] + params["b_out"]
    prob = jax.nn.softmax(logits, axis=-1)
    lse = jax.scipy.special.logsumexp(logits, axis=-1)
    tgt = jnp.take_along_axis(logits, labels[:, None], axis=-1)[:, 0]
    loss = jnp.mean(lse - tgt)
    return loss, prob


if __name__ == "__main__":
    # Small shapes consistent with Model.forward:
    #   input_ids: (batch, block_size), labels: (batch,)
    BATCH, BLOCK_SIZE, HIDDEN, NUM_LABELS, VOCAB = 2, 8, 32, 4, 50

    key = jax.random.PRNGKey(0)
    k_ids, k_params = jax.random.split(key)

    input_ids = jax.random.randint(k_ids, (BATCH, BLOCK_SIZE), 0, VOCAB, dtype=jnp.int32)
    labels = jnp.array([1, 3], dtype=jnp.int32)
    params = init_params(k_params, VOCAB, HIDDEN, NUM_LABELS)

    kparams, num_labels = prepare_params(params)              # one-time weight prep

    loss, prob = model_forward(input_ids, labels, kparams, BLOCK_SIZE, num_labels)
    jax.block_until_ready((loss, prob))

    ref_loss, ref_prob = reference_forward(input_ids, labels, params, BLOCK_SIZE)

    assert prob.shape == (BATCH, NUM_LABELS)
    assert loss.shape == ()
    assert bool(jnp.all(jnp.isfinite(prob))) and bool(jnp.isfinite(loss))
    # bf16 weights/features -> loose tolerance vs f32 reference
    assert jnp.allclose(prob, ref_prob, atol=3e-2, rtol=3e-2)
    assert jnp.allclose(loss, ref_loss, atol=3e-2, rtol=3e-2)
    print("KERNEL_OK")
</pallas_src>

<mosaic_0001>
module attributes {stable_mosaic.version = 11 : i64} {
  func.func @classifier_head_kernel(%arg0: i32, %arg1: memref<16x32xbf16, #tpu.memory_space<vmem>>, %arg2: memref<32x32xbf16, #tpu.memory_space<vmem>>, %arg3: memref<1x32xf32, #tpu.memory_space<vmem>>, %arg4: memref<32x128xbf16, #tpu.memory_space<vmem>>, %arg5: memref<1x128xf32, #tpu.memory_space<vmem>>, %arg6: memref<16x1xi32, #tpu.memory_space<vmem>>, %arg7: memref<16x128xf32, #tpu.memory_space<vmem>>, %arg8: memref<16x1xf32, #tpu.memory_space<vmem>>) attributes {dimension_semantics = [#tpu.dimension_semantics<parallel>], iteration_bounds = array<i64: 1>, scalar_prefetch = 0 : i64, scratch_operands = 0 : i64, tpu.core_type = #tpu.core_type<tc>, window_params = [{transform_indices = @transform_0, window_bounds = array<i64: 16, 32>}, {pipeline_mode = #tpu.pipeline_mode<synchronous>, transform_indices = @transform_1, window_bounds = array<i64: 32, 32>}, {pipeline_mode = #tpu.pipeline_mode<synchronous>, transform_indices = @transform_2, window_bounds = array<i64: 1, 32>}, {pipeline_mode = #tpu.pipeline_mode<synchronous>, transform_indices = @transform_3, window_bounds = array<i64: 32, 128>}, {pipeline_mode = #tpu.pipeline_mode<synchronous>, transform_indices = @transform_4, window_bounds = array<i64: 1, 128>}, {transform_indices = @transform_5, window_bounds = array<i64: 16, 1>}, {transform_indices = @transform_6, window_bounds = array<i64: 16, 128>}, {transform_indices = @transform_7, window_bounds = array<i64: 16, 1>}]} {
    %c0 = arith.constant 0 : index
    %c0_0 = arith.constant 0 : index
    %0 = vector.load %arg1[%c0, %c0_0] : memref<16x32xbf16, #tpu.memory_space<vmem>>, vector<16x32xbf16>
    %c0_1 = arith.constant 0 : index
    %c0_2 = arith.constant 0 : index
    %1 = vector.load %arg2[%c0_1, %c0_2] : memref<32x32xbf16, #tpu.memory_space<vmem>>, vector<32x32xbf16>
    %cst = arith.constant dense<0.000000e+00> : vector<16x32xf32>
    %2 = tpu.matmul %0, %1, %cst {dimension_numbers = #tpu.dot_dimension_numbers<[1], [0], [0], [1], [0, 0, 1, 1], [], []>} : vector<16x32xbf16>, vector<32x32xbf16>, vector<16x32xf32> -> vector<16x32xf32>
    %c0_3 = arith.constant 0 : index
    %c0_4 = arith.constant 0 : index
    %3 = vector.load %arg3[%c0_3, %c0_4] : memref<1x32xf32, #tpu.memory_space<vmem>>, vector<1x32xf32>
    %4 = vector.broadcast %3 : vector<1x32xf32> to vector<16x32xf32>
    %5 = arith.addf %2, %4 : vector<16x32xf32>
    %6 = math.tanh %5 : vector<16x32xf32>
    %7 = arith.truncf %6 : vector<16x32xf32> to vector<16x32xbf16>
    %c0_5 = arith.constant 0 : index
    %c0_6 = arith.constant 0 : index
    %8 = vector.load %arg4[%c0_5, %c0_6] : memref<32x128xbf16, #tpu.memory_space<vmem>>, vector<32x128xbf16>
    %cst_7 = arith.constant dense<0.000000e+00> : vector<16x128xf32>
    %9 = tpu.matmul %7, %8, %cst_7 {dimension_numbers = #tpu.dot_dimension_numbers<[1], [0], [0], [1], [0, 0, 1, 1], [], []>} : vector<16x32xbf16>, vector<32x128xbf16>, vector<16x128xf32> -> vector<16x128xf32>
    %c0_8 = arith.constant 0 : index
    %c0_9 = arith.constant 0 : index
    %10 = vector.load %arg5[%c0_8, %c0_9] : memref<1x128xf32, #tpu.memory_space<vmem>>, vector<1x128xf32>
    %11 = vector.broadcast %10 : vector<1x128xf32> to vector<16x128xf32>
    %12 = arith.addf %9, %11 : vector<16x128xf32>
    %cst_10 = arith.constant dense<0xFF800000> : vector<16xf32>
    %13 = vector.multi_reduction <maximumf>, %12, %cst_10 [1] : vector<16x128xf32> to vector<16xf32>
    %14 = vector.shape_cast %13 : vector<16xf32> to vector<16x1xf32>
    %15 = vector.broadcast %14 : vector<16x1xf32> to vector<16x128xf32>
    %16 = arith.subf %12, %15 : vector<16x128xf32>
    %17 = math.exp %16 : vector<16x128xf32>
    %cst_11 = arith.constant dense<0.000000e+00> : vector<16xf32>
    %18 = vector.multi_reduction <add>, %17, %cst_11 [1] : vector<16x128xf32> to vector<16xf32>
    %19 = vector.shape_cast %18 : vector<16xf32> to vector<16x1xf32>
    %20 = vector.broadcast %19 : vector<16x1xf32> to vector<16x128xf32>
    %21 = arith.divf %17, %20 : vector<16x128xf32>
    %c0_12 = arith.constant 0 : index
    %c0_13 = arith.constant 0 : index
    %22 = vector.load %arg7[%c0_12, %c0_13] : memref<16x128xf32, #tpu.memory_space<vmem>>, vector<16x128xf32>
    tpu.vector_store %arg7[%c0_12, %c0_13], %21 {strides = array<i32>} : memref<16x128xf32, #tpu.memory_space<vmem>>, vector<16x128xf32>,
    %23 = math.log %19 : vector<16x1xf32>
    %24 = arith.addf %14, %23 : vector<16x1xf32>
    %c0_14 = arith.constant 0 : index
    %c0_15 = arith.constant 0 : index
    %25 = vector.load %arg6[%c0_14, %c0_15] : memref<16x1xi32, #tpu.memory_space<vmem>>, vector<16x1xi32>
    %26 = tpu.iota {dimensions = array<i32: 1>} : vector<16x128xi32>
    %27 = vector.broadcast %25 : vector<16x1xi32> to vector<16x128xi32>
    %28 = arith.cmpi eq, %26, %27 : vector<16x128xi32>
    %cst_16 = arith.constant 0.000000e+00 : f32
    %29 = vector.broadcast %cst_16 : f32 to vector<16x128xf32>
    %30 = arith.select %28, %12, %29 : vector<16x128xi1>, vector<16x128xf32>
    %cst_17 = arith.constant dense<0.000000e+00> : vector<16xf32>
    %31 = vector.multi_reduction <add>, %30, %cst_17 [1] : vector<16x128xf32> to vector<16xf32>
    %32 = vector.shape_cast %31 : vector<16xf32> to vector<16x1xf32>
    %c0_i32 = arith.constant 0 : i32
    %33 = vector.broadcast %c0_i32 : i32 to vector<16x1xi32>
    %34 = arith.cmpi sge, %25, %33 : vector<16x1xi32>
    %35 = arith.extui %34 : vector<16x1xi1> to vector<16x1xi32>
    %36 = arith.sitofp %35 : vector<16x1xi32> to vector<16x1xf32>
    %37 = arith.subf %24, %32 : vector<16x1xf32>
    %38 = arith.mulf %37, %36 : vector<16x1xf32>
    %c0_18 = arith.constant 0 : index
    %c0_19 = arith.constant 0 : index
    %39 = vector.load %arg8[%c0_18, %c0_19] : memref<16x1xf32, #tpu.memory_space<vmem>>, vector<16x1xf32>
    tpu.vector_store %arg8[%c0_18, %c0_19], %38 {strides = array<i32>} : memref<16x1xf32, #tpu.memory_space<vmem>>, vector<16x1xf32>,
    return
  }
  func.func @transform_0(%arg0: i32) -> (i32, i32) {
    %c0_i32 = arith.constant 0 : i32
    %c0_i32_0 = arith.constant 0 : i32
    return %arg0, %c0_i32 : i32, i32
  }
  func.func @transform_1(%arg0: i32) -> (i32, i32) {
    %c0_i32 = arith.constant 0 : i32
    %c0_i32_0 = arith.constant 0 : i32
    %c0_i32_1 = arith.constant 0 : i32
    return %c0_i32, %c0_i32_0 : i32, i32
  }
  func.func @transform_2(%arg0: i32) -> (i32, i32) {
    %c0_i32 = arith.constant 0 : i32
    %c0_i32_0 = arith.constant 0 : i32
    %c0_i32_1 = arith.constant 0 : i32
    return %c0_i32, %c0_i32_0 : i32, i32
  }
  func.func @transform_3(%arg0: i32) -> (i32, i32) {
    %c0_i32 = arith.constant 0 : i32
    %c0_i32_0 = arith.constant 0 : i32
    %c0_i32_1 = arith.constant 0 : i32
    return %c0_i32, %c0_i32_0 : i32, i32
  }
  func.func @transform_4(%arg0: i32) -> (i32, i32) {
    %c0_i32 = arith.constant 0 : i32
    %c0_i32_0 = arith.constant 0 : i32
    %c0_i32_1 = arith.constant 0 : i32
    return %c0_i32, %c0_i32_0 : i32, i32
  }
  func.func @transform_5(%arg0: i32) -> (i32, i32) {
    %c0_i32 = arith.constant 0 : i32
    %c0_i32_0 = arith.constant 0 : i32
    return %arg0, %c0_i32 : i32, i32
  }
  func.func @transform_6(%arg0: i32) -> (i32, i32) {
    %c0_i32 = arith.constant 0 : i32
    %c0_i32_0 = arith.constant 0 : i32
    return %arg0, %c0_i32 : i32, i32
  }
  func.func @transform_7(%arg0: i32) -> (i32, i32) {
    %c0_i32 = arith.constant 0 : i32
    %c0_i32_0 = arith.constant 0 : i32
    return %arg0, %c0_i32 : i32, i32
  }
}

</mosaic_0001>

<bundles_post_ra>
// kernel: model_forward.1
= control target key start
LH: loop header
LB: loop body
LE: loop exit
PB: predicated region body
PF: predicated region fallthrough
CT: control target
= control target key end

     0   :  { %v295_v0 = vmov 0.0   ;;  %vm296_vm0 = vmmov 0   ;;  %vm56_vm1 = vcmask 261120   ;;  %v297_v6 = vmov 0   ;;  %s395_s1 = inlined_call_operand.vmem [shape: bf16[32,32], index: 1, kind: input, shape index: {}]   ;;  %s396_s0 = inlined_call_operand.vmem [shape: bf16[16,32], index: 0, kind: input, shape index: {}]   ;;  %s397_s3 = inlined_call_operand.vmem [shape: bf16[32,128], index: 3, kind: input, shape index: {}]   ;;  %s398_s5 = inlined_call_operand.vmem [shape: s32[16,1], index: 5, kind: input, shape index: {}]   ;;  %s399_s2 = inlined_call_operand.vmem [shape: f32[1,32], index: 2, kind: input, shape index: {}]   ;;  %s400_s4 = inlined_call_operand.vmem [shape: f32[1,128], index: 4, kind: input, shape index: {}]   ;;  %s401_s6 = inlined_call_operand.vmem [shape: f32[16,128], index: 6, kind: output, shape index: {0}]   ;;  %s402_s7 = inlined_call_operand.vmem [shape: f32[16,1], index: 7, kind: output, shape index: {1}]  }
   0x1   :  { %253 = vmatprep.subr.bf16.mxu0 %v295_v0  ;;  %v274_v1 = vld [vmem:[%s395_s1] sm:$0xff]   ;;  %257 = vmatprep.mubr.msk.bf16.mxu0 %vm296_vm0, %v295_v0  ;;  %v275_v2 = vld [vmem:[%s395_s1 + $0x8] sm:$0xff]   ;;  %v199_v32 = vlaneseq  ;;  %vm225_vm6 = vcmask 7168  }
   0x2   :  { %261 = vmatprep.subr.bf16.mxu1 %v295_v0  ;;  %265 = vmatprep.mubr.msk.bf16.mxu1 %vm296_vm0, %v295_v0  ;;  %v276_v3 = vld [vmem:[%s396_s0] sm:$0xff]   ;;  %v278_v5 = vld [vmem:[%s397_s3 + $0x8] sm:$0xff]  }
   0x3   :  { %254 = vmatpush3.bf16.msra.mxu0 %v274_v1  ;;  %v277_v4 = vld [vmem:[%s397_s3] sm:$0xff]   ;;  %272 = vset.pattern.permute.xlu1 %v297_v6  ;;  %v369_v8 = vld [vmem:[%s398_s5 + $0x8] sm:$0xff]  ;;  %v200_v34 = vand.u32 127, %v199_v32 }
   0x4   :  { %255 = vmatprep.subr.bf16.mxu0 %v295_v0  ;;  %262 = vmatpush3.bf16.msra.mxu1 %v277_v4  ;;  %v363_v7 = vld [vmem:[%s398_s5] sm:$0xff]  ;;  %vm216_vm5 = vcmp.ge.s32.totalorder %v369_v8, 0 }
   0x5   :  { %263 = vmatprep.subr.bf16.mxu1 %v295_v0  ;;  %273 = vset.pattern.permute.xlu0 %v297_v6  ;;  %v236_v9 = vld [vmem:[%s399_s2] ss:$0 sm:$0xff]  ;;  %vm215_vm4 = vcmp.ge.s32.totalorder %v363_v7, 0  ;;  %v246_v56 = vsel %vm216_vm5, 1.0, %v295_v0 }
   0x6   :  { %202 = vperm.xlu1 %272, %v363_v7   ;;  %v241_v19 = vld [vmem:[%s400_s4] ss:$0 sm:$0xff]  ;;  %v245_v50 = vsel %vm215_vm4, 1.0, %v295_v0 }
   0x7   :  { %256 = vmatpush3.bf16.msra.mxu0 %v275_v2 }
   0x8   :  { %264 = vmatpush3.bf16.msra.mxu1 %v278_v5 }
   0xa   :  { %258 = vmatmul.mubr.msk.bf16.vlgmr.msra.gmra.mrb[0].mxu0 %vm56_vm1, %v276_v3  ;;  %205 = vperm.xlu1 %272, %v369_v8  }
  0x85   :  { %v203_v33 = vpop.permute.xlu1 %202 }
  0x86   :  { %vm207_vm2 = vcmp.eq.s32.totalorder %v200_v34, %v203_v33 }
  0x89   :  { %v206_v36 = vpop.permute.xlu1 %205 }
  0x8a   :  { %vm208_vm3 = vcmp.eq.s32.totalorder %v200_v34, %v206_v36 }
  0xdd   :  { %v94_v10 = vpop.f32.mrb[0].mxu0 }
  0xde   :  { %v95_v11 = vadd.f32 %v236_v9, %v94_v10  ;;  %v259_v12 = vpop.f32.mrb[1].mxu0 }
  0xdf   :  { %v97_v13 = vpop.f32.mrb[2].mxu0 }
  0xe0   :  { %v98_v14 = vadd.f32 %v236_v9, %v97_v13  ;;  %v260_v15 = vpop.f32.mrb[3].mxu0  ;;  %279 = vtanh.f32 %v95_v11 }
  0xe2   :  { %281 = vtanh.f32 %v98_v14 }
  0xea   :  { %v280_v16 = vpop.eup %279 }
  0xec   :  { %v282_v17 = vpop.eup %281 }
  0xed   :  { %v103_v18 = vpack.c.bf16 %v282_v17, %v280_v16 }
  0xef   :  { %266 = vmatmul.mubr.msk.bf16.vlgmr.msra.gmra.mrb[0].mxu1 %vm56_vm1, %v103_v18 }
 0x1c2   :  { %v164_v20 = vpop.f32.mrb[0].mxu1 }
 0x1c3   :  { %v165_v21 = vadd.f32 %v241_v19, %v164_v20  ;;  %v267_v22 = vpop.f32.mrb[1].mxu1 }
 0x1c4   :  { %v167_v23 = vpop.f32.mrb[2].mxu1 }
 0x1c5   :  { %171 = vmax.xlane.f32.xlu0 %v165_v21  ;;  %v268_v24 = vpop.f32.mrb[3].mxu1  ;;  %v168_v25 = vadd.f32 %v241_v19, %v167_v23  ;;  %v209_v38 = vsel %vm207_vm2, %v165_v21, 0.0 }
 0x1c7   :  { %v210_v39 = vsel %vm208_vm3, %v168_v25, 0.0 }
 0x1c9   :  { %173 = vmax.xlane.f32.xlu0 %v168_v25 }
 0x252   :  { %v172_v26 = vpop.xlane.xlu0 %171 }
 0x253   :  { %v175_v27 = vsub.f32 %v165_v21, %v172_v26 }
 0x255   :  { %v177_v28 = vmul.f32 1.442695, %v175_v27 }
 0x256   :  { %v174_v29 = vpop.xlane.xlu0 %173 }
 0x257   :  { %283 = vpow2.f32 %v177_v28  ;;  %v176_v30 = vsub.f32 %v168_v25, %v174_v29 }
 0x259   :  { %v179_v31 = vmul.f32 1.442695, %v176_v30 }
 0x25b   :  { %285 = vpow2.f32 %v179_v31 }
 0x261   :  { %v284_v35 = vpop.eup %283 }
 0x262   :  { %181 = vadd.xlane.f32.xlu0 %v284_v35 }
 0x265   :  { %v286_v37 = vpop.eup %285 }
 0x266   :  { %211 = vadd.xlane.f32.xlu0 %v209_v38  ;;  %183 = vadd.xlane.f32.xlu1 %v286_v37 }
 0x26a   :  { %213 = vadd.xlane.f32.xlu0 %v210_v39 }
 0x2ef   :  { %v182_v40 = vpop.xlane.xlu0 %181 }
 0x2f0   :  { %287 = vrcp.f32 %v182_v40 }
 0x2f1   :  { %289 = vlog2.f32 %v182_v40 }
 0x2f3   :  { %v184_v41 = vpop.xlane.xlu1 %183  ;;  %v212_v46 = vpop.xlane.xlu0 %211 }
 0x2f4   :  { %291 = vrcp.f32 %v184_v41 }
 0x2f5   :  { %293 = vlog2.f32 %v184_v41 }
 0x2f7   :  { %v214_v57 = vpop.xlane.xlu0 %213 }
 0x2fa   :  { %v288_v42 = vpop.eup %287 }
 0x2fb   :  { %v290_v43 = vpop.eup %289  ;;  %v186_v44 = vmul.f32 %v288_v42, %v284_v35 }
 0x2fc   :  { %v192_v45 = vmul.f32 0.6931472, %v290_v43 }
 0x2fd   :  { %189 = vst [vmem:[%s401_s6] sm:$0xff] %v186_v44 }
 0x2fe   :  { %v292_v47 = vpop.eup %291  ;;  %v195_v48 = vadd.f32 %v192_v45, %v172_v26 }
 0x2ff   :  { %v294_v49 = vpop.eup %293  ;;  %v188_v51 = vmul.f32 %v292_v47, %v286_v37 }
 0x300   :  { %v194_v52 = vmul.f32 0.6931472, %v294_v49  ;;  %v221_v53 = vsub.f32 %v195_v48, %v212_v46 }
 0x301   :  { %190 = vst [vmem:[%s401_s6 + $0x8] sm:$0xff] %v188_v51 }
 0x302   :  { %v223_v54 = vmul.f32 %v245_v50, %v221_v53  ;;  %v196_v55 = vadd.f32 %v194_v52, %v174_v29 }
 0x304   :  { %226 = vst.msk [vmem:[%s402_s7] sm:$0xff] %vm225_vm6, %v223_v54  ;;  %v222_v58 = vsub.f32 %v196_v55, %v214_v57 }
 0x306   :  { %v224_v59 = vmul.f32 %v246_v56, %v222_v58 }
 0x308   :  { %227 = vst.msk [vmem:[%s402_s7 + $0x8] sm:$0xff] %vm225_vm6, %v224_v59 }

</bundles_post_ra>
